<compile_context>
chip_gen: v6e
topology: v6e:2x2x1
jax: 0.10.0
libtpu: 0.0.40
codegen_flags: <defaults>
</compile_context>

<pallas_src>
import math
import numpy as np
import jax
import jax.numpy as jnp
from jax import lax
from jax.experimental import pallas as pl
from jax.experimental.pallas import tpu as pltpu  # noqa: F401  (TPU backend)

# ---------------- config (small, consistent with the module) ----------------
B = 2        # batch
T = 8        # sequence length
C = 32       # n_embd
N_HEAD = 4   # n_head
HD = C // N_HEAD
BT = B * T
EPS = 1e-5
NEG = -1e30  # additive mask value (finite: avoids inf-inf NaNs)

LANES = 128  # lane width of the packed parameter slab

# Row offsets inside the packed parameter slab (all blocks lane-padded to 128).
R_WQKV = 0                         # (C, 3C)   fused qkv weight (q pre-scaled)
R_W1 = R_WQKV + C                  # (C, 4C)   MLP in
R_W2 = R_W1 + C                    # (4C, C)   MLP out
R_WP = R_W2 + 4 * C                # (C, C)    attention output projection
R_VEC = R_WP + C                   # 8 rows of (1, *) vectors, see below
R_HMASK = R_VEC + 8                # (N_HEAD*BT, C)  0/1 per-head column mask
R_BIAS = R_HMASK + N_HEAD * BT     # (N_HEAD*BT, BT) additive batch mask (0 / NEG)
SLAB_ROWS = R_BIAS + N_HEAD * BT   # 360

# MXU operand dtype.  float32 keeps fidelity with torch at these toy sizes;
# switch to jnp.bfloat16 on v5e/v6e/v7x at real model sizes (accumulation
# stays f32 via preferred_element_type; keep LN/softmax/GELU math in f32).
MATMUL_DTYPE = jnp.float32


def _mm(a, b):
    """a @ b with f32 accumulation on the MXU."""
    return jnp.dot(a.astype(MATMUL_DTYPE), b.astype(MATMUL_DTYPE),
                   preferred_element_type=jnp.float32)


def _mm_t(a, b):
    """a @ b.T (contract last dims) with f32 accumulation, no transpose op."""
    return lax.dot_general(a.astype(MATMUL_DTYPE), b.astype(MATMUL_DTYPE),
                           (((1,), (1,)), ((), ())),
                           preferred_element_type=jnp.float32)


def _layernorm(x, gamma, beta):
    # x: (BT, C), gamma/beta: (1, C)
    mu = jnp.mean(x, axis=-1, keepdims=True)
    var = jnp.mean((x - mu) ** 2, axis=-1, keepdims=True)
    return (x - mu) * lax.rsqrt(var + EPS) * gamma + beta


def _erf(z):
    # Abramowitz & Stegun 7.1.26 rational approximation, |err| <= 1.5e-7.
    a1, a2, a3, a4, a5 = 0.254829592, -0.284496736, 1.421413741, -1.453152027, 1.061405429
    pp = 0.3275911
    az = jnp.abs(z)
    t = 1.0 / (1.0 + pp * az)
    poly = ((((a5 * t + a4) * t + a3) * t + a2) * t + a1) * t
    r = 1.0 - poly * jnp.exp(-az * az)
    return jnp.where(z >= 0, r, -r)


def _gelu(z):
    # exact (erf-based) GELU, matching torch.nn.GELU default
    return 0.5 * z * (1.0 + _erf(z * (1.0 / math.sqrt(2.0))))


def gpt_block_kernel(x_ref, slab_ref, out_ref):
    x = x_ref[...]                                       # (BT, C)

    # ---- packed small vectors -------------------------------------------
    vec = slab_ref[R_VEC:R_VEC + 8, :]                   # (8, 128)
    ln1_g, ln1_b = vec[0:1, 0:C], vec[1:2, 0:C]
    ln2_g, ln2_b = vec[2:3, 0:C], vec[3:4, 0:C]
    b_qkv = vec[4:5, :]                                  # (1, 128); cols 96:128 are 0
    bp = vec[5:6, 0:C]
    b1 = vec[6:7, :]                                     # (1, 128)
    b2 = vec[7:8, 0:C]

    head_mask = slab_ref[R_HMASK:R_HMASK + N_HEAD * BT, 0:C]   # (N_HEAD*BT, C)
    att_bias = slab_ref[R_BIAS:R_BIAS + N_HEAD * BT, 0:BT]     # (N_HEAD*BT, BT)

    # ---------------- attention branch ----------------
    h = _layernorm(x, ln1_g, ln1_b)

    # Fused QKV: one (BT,C) x (C,128) matmul; cols 96:128 of the padded
    # weight/bias are zero so qkv[:, 96:128] == 0 (unused).
    qkv = _mm(h, slab_ref[R_WQKV:R_WQKV + C, :]) + b_qkv        # (BT, 128)
    q = qkv[:, 0:C]            # 1/sqrt(HD) already folded into wq/bq
    k = qkv[:, C:2 * C]
    v = qkv[:, 2 * C:3 * C]

    # Block-diagonal head stacking: row block hh holds q masked to head hh's
    # columns, so ONE matmul gives every head's scores.
    q_stack = jnp.broadcast_to(q[None, :, :], (N_HEAD, BT, C)).reshape(
        N_HEAD * BT, C) * head_mask                             # (N_HEAD*BT, C)
    scores = _mm_t(q_stack, k) + att_bias                       # (N_HEAD*BT, BT)

    # ONE softmax over the stacked score slab; divide on the EUP.
    scores = scores - jnp.max(scores, axis=-1, keepdims=True)
    e = jnp.exp(scores)
    p = e * pl.reciprocal(jnp.sum(e, axis=-1, keepdims=True), approx=True)

    # ONE PV matmul, then head-concat by masking to each head's lane slice
    # and summing the row blocks (pure VPU, no lane concat / per-head matmul).
    pv = _mm(p, v) * head_mask                                  # (N_HEAD*BT, C)
    y_concat = pv[0:BT, :]
    for hh in range(1, N_HEAD):                                 # static, tiny
        y_concat = y_concat + pv[hh * BT:(hh + 1) * BT, :]

    # ONE full output projection.
    y = _mm(y_concat, slab_ref[R_WP:R_WP + C, :])[:, 0:C] + bp
    x1 = x + y                                                  # residual 1

    # ---------------- MLP branch ----------------
    m = _layernorm(x1, ln2_g, ln2_b)
    hmid = _mm(m, slab_ref[R_W1:R_W1 + C, :]) + b1              # (BT, 4C)
    hmid = _gelu(hmid)
    out_ref[...] = x1 + _mm(hmid, slab_ref[R_W2:R_W2 + 4 * C, :])[:, 0:C] + b2


def prepare_params(params):
    """One-time host-side packing of all weights/biases/masks into a single
    lane-dense (SLAB_ROWS, 128) f32 slab.  Runs once, outside the jitted
    per-call path."""
    (ln1_g, ln1_b, wq, bq, wk, bk, wv, bv, wp, bp,
     ln2_g, ln2_b, w1, b1, w2, b2) = params

    # Fold the 1/sqrt(head_dim) attention scale into the query projection.
    scale = 1.0 / math.sqrt(HD)
    wq = wq * scale
    bq = bq * scale

    w_qkv = jnp.concatenate([wq, wk, wv], axis=1)               # (C, 3C)
    b_qkv = jnp.concatenate([bq, bk, bv], axis=1)               # (1, 3C)

    def padl(a):
        a = jnp.asarray(a, jnp.float32)
        return jnp.pad(a, ((0, 0), (0, LANES - a.shape[1])))

    vec_rows = jnp.concatenate(
        [padl(ln1_g), padl(ln1_b), padl(ln2_g), padl(ln2_b),
         padl(b_qkv), padl(bp), padl(b1), padl(b2)], axis=0)    # (8, 128)

    # Constant masks (numpy, computed once).
    rows = np.arange(N_HEAD * BT)
    head_of_row = rows // BT
    tok_of_row = rows % BT
    head_mask = (np.arange(C)[None, :] // HD == head_of_row[:, None]
                 ).astype(np.float32)                           # (N_HEAD*BT, C)
    att_bias = np.where((tok_of_row[:, None] // T) == (np.arange(BT)[None, :] // T),
                        0.0, NEG).astype(np.float32)            # (N_HEAD*BT, BT)

    slab = jnp.concatenate([
        padl(w_qkv),          # rows   0: 32
        padl(w1),             # rows  32: 64
        padl(w2),             # rows  64:192
        padl(wp),             # rows 192:224
        vec_rows,             # rows 224:232
        padl(head_mask),      # rows 232:296
        padl(att_bias),       # rows 296:360
    ], axis=0)
    assert slab.shape == (SLAB_ROWS, LANES)
    return slab


@jax.jit
def gpt_block(x, slab):
    x2d = x.reshape(BT, C)   # fold batch into the sequence axis (free reshape)
    out2d = pl.pallas_call(
        gpt_block_kernel,
        out_shape=jax.ShapeDtypeStruct((BT, C), jnp.float32),
        # No grid: single invocation, every operand (< 200 KiB total) mapped
        # whole into VMEM.  See scaling note at the top for real model dims.
    )(x2d, slab)
    return out2d.reshape(B, T, C)


# ---------------- pure-JAX reference for verification ----------------
def gpt_block_ref(x, params):
    (ln1_g, ln1_b, wq, bq, wk, bk, wv, bv, wp, bp,
     ln2_g, ln2_b, w1, b1, w2, b2) = params

    def ln(z, g, bta):
        mu = jnp.mean(z, axis=-1, keepdims=True)
        var = jnp.mean((z - mu) ** 2, axis=-1, keepdims=True)
        return (z - mu) / jnp.sqrt(var + EPS) * g + bta

    h = ln(x, ln1_g, ln1_b)
    q = h @ wq + bq
    k = h @ wk + bk
    v = h @ wv + bv
    q = q.reshape(B, T, N_HEAD, HD).transpose(0, 2, 1, 3)
    k = k.reshape(B, T, N_HEAD, HD).transpose(0, 2, 1, 3)
    v = v.reshape(B, T, N_HEAD, HD).transpose(0, 2, 1, 3)
    att = (q @ jnp.swapaxes(k, -2, -1)) / math.sqrt(HD)
    att = jax.nn.softmax(att, axis=-1)
    y = (att @ v).transpose(0, 2, 1, 3).reshape(B, T, C)
    y = y @ wp + bp
    x1 = x + y
    m = ln(x1, ln2_g, ln2_b)
    hmid = m @ w1 + b1
    hmid = 0.5 * hmid * (1.0 + lax.erf(hmid / math.sqrt(2.0)))
    return x1 + (hmid @ w2 + b2)


if __name__ == "__main__":
    key = jax.random.PRNGKey(0)
    ks = jax.random.split(key, 12)

    x = jax.random.normal(ks[0], (B, T, C), dtype=jnp.float32)

    def lin_init(k, fan_in, shape):
        bound = 1.0 / math.sqrt(fan_in)
        return jax.random.uniform(k, shape, jnp.float32, -bound, bound)

    ln1_g = jnp.ones((1, C), jnp.float32)
    ln1_b = jnp.zeros((1, C), jnp.float32)
    ln2_g = jnp.ones((1, C), jnp.float32)
    ln2_b = jnp.zeros((1, C), jnp.float32)

    wq = lin_init(ks[1], C, (C, C)); bq = lin_init(ks[2], C, (1, C))
    wk = lin_init(ks[3], C, (C, C)); bk = lin_init(ks[4], C, (1, C))
    wv = lin_init(ks[5], C, (C, C)); bv = lin_init(ks[6], C, (1, C))
    wp = lin_init(ks[7], C, (C, C)); bp = lin_init(ks[8], C, (1, C))
    w1 = lin_init(ks[9], C, (C, 4 * C)); b1 = lin_init(ks[10], C, (1, 4 * C))
    w2 = lin_init(ks[11], 4 * C, (4 * C, C))
    b2 = lin_init(jax.random.fold_in(key, 99), 4 * C, (1, C))

    params = (ln1_g, ln1_b, wq, bq, wk, bk, wv, bv, wp, bp,
              ln2_g, ln2_b, w1, b1, w2, b2)

    # One-time parameter packing (outside the per-call jitted path).
    slab = jax.block_until_ready(prepare_params(params))

    out = gpt_block(x, slab)
    out = jax.block_until_ready(out)

    ref = gpt_block_ref(x, params)
    # Tolerance covers the approximate EUP reciprocal in the softmax
    # (~2e-4 rel) and the in-kernel erf polynomial (<=1.5e-7 abs).
    assert jnp.allclose(out, ref, atol=2e-3, rtol=2e-3), "mismatch vs reference"

    print("KERNEL_OK")
</pallas_src>

<mosaic_0001>
module attributes {stable_mosaic.version = 11 : i64} {
  func.func @gpt_block_kernel(%arg0: memref<16x32xf32, #tpu.memory_space<vmem>>, %arg1: memref<360x128xf32, #tpu.memory_space<vmem>>, %arg2: memref<16x32xf32, #tpu.memory_space<vmem>>) attributes {dimension_semantics = [], scalar_prefetch = 0 : i64, scratch_operands = 0 : i64, tpu.core_type = #tpu.core_type<tc>} {
    %c0 = arith.constant 0 : index
    %c0_0 = arith.constant 0 : index
    %0 = vector.load %arg0[%c0, %c0_0] : memref<16x32xf32, #tpu.memory_space<vmem>>, vector<16x32xf32>
    %c224 = arith.constant 224 : index
    %c0_1 = arith.constant 0 : index
    %1 = vector.load %arg1[%c224, %c0_1] : memref<360x128xf32, #tpu.memory_space<vmem>>, vector<8x128xf32>
    %2 = vector.extract_strided_slice %1 {offsets = [0, 0], sizes = [1, 32], strides = [1, 1]} : vector<8x128xf32> to vector<1x32xf32>
    %3 = vector.extract_strided_slice %1 {offsets = [1, 0], sizes = [1, 32], strides = [1, 1]} : vector<8x128xf32> to vector<1x32xf32>
    %4 = vector.extract_strided_slice %1 {offsets = [2, 0], sizes = [1, 32], strides = [1, 1]} : vector<8x128xf32> to vector<1x32xf32>
    %5 = vector.extract_strided_slice %1 {offsets = [3, 0], sizes = [1, 32], strides = [1, 1]} : vector<8x128xf32> to vector<1x32xf32>
    %6 = vector.extract_strided_slice %1 {offsets = [4, 0], sizes = [1, 128], strides = [1, 1]} : vector<8x128xf32> to vector<1x128xf32>
    %7 = vector.extract_strided_slice %1 {offsets = [5, 0], sizes = [1, 32], strides = [1, 1]} : vector<8x128xf32> to vector<1x32xf32>
    %8 = vector.extract_strided_slice %1 {offsets = [6, 0], sizes = [1, 128], strides = [1, 1]} : vector<8x128xf32> to vector<1x128xf32>
    %9 = vector.extract_strided_slice %1 {offsets = [7, 0], sizes = [1, 32], strides = [1, 1]} : vector<8x128xf32> to vector<1x32xf32>
    %c232 = arith.constant 232 : index
    %c0_2 = arith.constant 0 : index
    %10 = vector.load %arg1[%c232, %c0_2] : memref<360x128xf32, #tpu.memory_space<vmem>>, vector<64x32xf32>
    %c296 = arith.constant 296 : index
    %c0_3 = arith.constant 0 : index
    %11 = vector.load %arg1[%c296, %c0_3] : memref<360x128xf32, #tpu.memory_space<vmem>>, vector<64x16xf32>
    %cst = arith.constant dense<0.000000e+00> : vector<16xf32>
    %12 = vector.multi_reduction <add>, %0, %cst [1] : vector<16x32xf32> to vector<16xf32>
    %13 = vector.shape_cast %12 : vector<16xf32> to vector<16x1xf32>
    %cst_4 = arith.constant 3.200000e+01 : f32
    %14 = vector.broadcast %cst_4 : f32 to vector<16x1xf32>
    %15 = arith.divf %13, %14 : vector<16x1xf32>
    %16 = vector.broadcast %15 : vector<16x1xf32> to vector<16x32xf32>
    %17 = arith.subf %0, %16 : vector<16x32xf32>
    %18 = arith.mulf %17, %17 : vector<16x32xf32>
    %cst_5 = arith.constant dense<0.000000e+00> : vector<16xf32>
    %19 = vector.multi_reduction <add>, %18, %cst_5 [1] : vector<16x32xf32> to vector<16xf32>
    %20 = vector.shape_cast %19 : vector<16xf32> to vector<16x1xf32>
    %cst_6 = arith.constant 3.200000e+01 : f32
    %21 = vector.broadcast %cst_6 : f32 to vector<16x1xf32>
    %22 = arith.divf %20, %21 : vector<16x1xf32>
    %23 = vector.broadcast %15 : vector<16x1xf32> to vector<16x32xf32>
    %24 = arith.subf %0, %23 : vector<16x32xf32>
    %cst_7 = arith.constant 9.99999974E-6 : f32
    %25 = vector.broadcast %cst_7 : f32 to vector<16x1xf32>
    %26 = arith.addf %22, %25 : vector<16x1xf32>
    %27 = math.rsqrt %26 : vector<16x1xf32>
    %28 = vector.broadcast %27 : vector<16x1xf32> to vector<16x32xf32>
    %29 = arith.mulf %24, %28 : vector<16x32xf32>
    %30 = vector.broadcast %2 : vector<1x32xf32> to vector<16x32xf32>
    %31 = arith.mulf %29, %30 : vector<16x32xf32>
    %32 = vector.broadcast %3 : vector<1x32xf32> to vector<16x32xf32>
    %33 = arith.addf %31, %32 : vector<16x32xf32>
    %c0_8 = arith.constant 0 : index
    %c0_9 = arith.constant 0 : index
    %34 = vector.load %arg1[%c0_8, %c0_9] : memref<360x128xf32, #tpu.memory_space<vmem>>, vector<32x128xf32>
    %cst_10 = arith.constant dense<0.000000e+00> : vector<16x128xf32>
    %35 = tpu.matmul %33, %34, %cst_10 {dimension_numbers = #tpu.dot_dimension_numbers<[1], [0], [0], [1], [0, 0, 1, 1], [], []>} : vector<16x32xf32>, vector<32x128xf32>, vector<16x128xf32> -> vector<16x128xf32>
    %36 = vector.broadcast %6 : vector<1x128xf32> to vector<16x128xf32>
    %37 = arith.addf %35, %36 : vector<16x128xf32>
    %38 = vector.extract_strided_slice %37 {offsets = [0, 0], sizes = [16, 32], strides = [1, 1]} : vector<16x128xf32> to vector<16x32xf32>
    %39 = vector.extract_strided_slice %37 {offsets = [0, 32], sizes = [16, 32], strides = [1, 1]} : vector<16x128xf32> to vector<16x32xf32>
    %40 = vector.extract_strided_slice %37 {offsets = [0, 64], sizes = [16, 32], strides = [1, 1]} : vector<16x128xf32> to vector<16x32xf32>
    %41 = vector.shape_cast %38 : vector<16x32xf32> to vector<1x16x32xf32>
    %42 = vector.shape_cast %41 : vector<1x16x32xf32> to vector<1x16x32xf32>
    %43 = vector.broadcast %42 : vector<1x16x32xf32> to vector<4x16x32xf32>
    %44 = vector.shape_cast %43 : vector<4x16x32xf32> to vector<64x32xf32>
    %45 = arith.mulf %44, %10 : vector<64x32xf32>
    %cst_11 = arith.constant dense<0.000000e+00> : vector<64x16xf32>
    %46 = tpu.matmul %45, %39, %cst_11 {dimension_numbers = #tpu.dot_dimension_numbers<[1], [1], [0], [0], [0, 0, 1, 0], [], []>} : vector<64x32xf32>, vector<16x32xf32>, vector<64x16xf32> -> vector<64x16xf32>
    %47 = arith.addf %46, %11 : vector<64x16xf32>
    %cst_12 = arith.constant dense<0xFF800000> : vector<64xf32>
    %48 = vector.multi_reduction <maximumf>, %47, %cst_12 [1] : vector<64x16xf32> to vector<64xf32>
    %49 = vector.shape_cast %48 : vector<64xf32> to vector<64x1xf32>
    %50 = vector.broadcast %49 : vector<64x1xf32> to vector<64x16xf32>
    %51 = arith.subf %47, %50 : vector<64x16xf32>
    %52 = math.exp %51 : vector<64x16xf32>
    %cst_13 = arith.constant dense<0.000000e+00> : vector<64xf32>
    %53 = vector.multi_reduction <add>, %52, %cst_13 [1] : vector<64x16xf32> to vector<64xf32>
    %54 = vector.shape_cast %53 : vector<64xf32> to vector<64x1xf32>
    %55 = tpu.reciprocal %54 {approx = true} : vector<64x1xf32> -> vector<64x1xf32>
    %56 = vector.broadcast %55 : vector<64x1xf32> to vector<64x16xf32>
    %57 = arith.mulf %52, %56 : vector<64x16xf32>
    %cst_14 = arith.constant dense<0.000000e+00> : vector<64x32xf32>
    %58 = tpu.matmul %57, %40, %cst_14 {dimension_numbers = #tpu.dot_dimension_numbers<[1], [0], [0], [1], [0, 0, 1, 1], [], []>} : vector<64x16xf32>, vector<16x32xf32>, vector<64x32xf32> -> vector<64x32xf32>
    %59 = arith.mulf %58, %10 : vector<64x32xf32>
    %60 = vector.extract_strided_slice %59 {offsets = [0, 0], sizes = [16, 32], strides = [1, 1]} : vector<64x32xf32> to vector<16x32xf32>
    %61 = vector.extract_strided_slice %59 {offsets = [16, 0], sizes = [16, 32], strides = [1, 1]} : vector<64x32xf32> to vector<16x32xf32>
    %62 = arith.addf %60, %61 : vector<16x32xf32>
    %63 = vector.extract_strided_slice %59 {offsets = [32, 0], sizes = [16, 32], strides = [1, 1]} : vector<64x32xf32> to vector<16x32xf32>
    %64 = arith.addf %62, %63 : vector<16x32xf32>
    %65 = vector.extract_strided_slice %59 {offsets = [48, 0], sizes = [16, 32], strides = [1, 1]} : vector<64x32xf32> to vector<16x32xf32>
    %66 = arith.addf %64, %65 : vector<16x32xf32>
    %c192 = arith.constant 192 : index
    %c0_15 = arith.constant 0 : index
    %67 = vector.load %arg1[%c192, %c0_15] : memref<360x128xf32, #tpu.memory_space<vmem>>, vector<32x128xf32>
    %cst_16 = arith.constant dense<0.000000e+00> : vector<16x128xf32>
    %68 = tpu.matmul %66, %67, %cst_16 {dimension_numbers = #tpu.dot_dimension_numbers<[1], [0], [0], [1], [0, 0, 1, 1], [], []>} : vector<16x32xf32>, vector<32x128xf32>, vector<16x128xf32> -> vector<16x128xf32>
    %69 = vector.extract_strided_slice %68 {offsets = [0, 0], sizes = [16, 32], strides = [1, 1]} : vector<16x128xf32> to vector<16x32xf32>
    %70 = vector.broadcast %7 : vector<1x32xf32> to vector<16x32xf32>
    %71 = arith.addf %69, %70 : vector<16x32xf32>
    %72 = arith.addf %0, %71 : vector<16x32xf32>
    %cst_17 = arith.constant dense<0.000000e+00> : vector<16xf32>
    %73 = vector.multi_reduction <add>, %72, %cst_17 [1] : vector<16x32xf32> to vector<16xf32>
    %74 = vector.shape_cast %73 : vector<16xf32> to vector<16x1xf32>
    %cst_18 = arith.constant 3.200000e+01 : f32
    %75 = vector.broadcast %cst_18 : f32 to vector<16x1xf32>
    %76 = arith.divf %74, %75 : vector<16x1xf32>
    %77 = vector.broadcast %76 : vector<16x1xf32> to vector<16x32xf32>
    %78 = arith.subf %72, %77 : vector<16x32xf32>
    %79 = arith.mulf %78, %78 : vector<16x32xf32>
    %cst_19 = arith.constant dense<0.000000e+00> : vector<16xf32>
    %80 = vector.multi_reduction <add>, %79, %cst_19 [1] : vector<16x32xf32> to vector<16xf32>
    %81 = vector.shape_cast %80 : vector<16xf32> to vector<16x1xf32>
    %cst_20 = arith.constant 3.200000e+01 : f32
    %82 = vector.broadcast %cst_20 : f32 to vector<16x1xf32>
    %83 = arith.divf %81, %82 : vector<16x1xf32>
    %84 = vector.broadcast %76 : vector<16x1xf32> to vector<16x32xf32>
    %85 = arith.subf %72, %84 : vector<16x32xf32>
    %cst_21 = arith.constant 9.99999974E-6 : f32
    %86 = vector.broadcast %cst_21 : f32 to vector<16x1xf32>
    %87 = arith.addf %83, %86 : vector<16x1xf32>
    %88 = math.rsqrt %87 : vector<16x1xf32>
    %89 = vector.broadcast %88 : vector<16x1xf32> to vector<16x32xf32>
    %90 = arith.mulf %85, %89 : vector<16x32xf32>
    %91 = vector.broadcast %4 : vector<1x32xf32> to vector<16x32xf32>
    %92 = arith.mulf %90, %91 : vector<16x32xf32>
    %93 = vector.broadcast %5 : vector<1x32xf32> to vector<16x32xf32>
    %94 = arith.addf %92, %93 : vector<16x32xf32>
    %c32 = arith.constant 32 : index
    %c0_22 = arith.constant 0 : index
    %95 = vector.load %arg1[%c32, %c0_22] : memref<360x128xf32, #tpu.memory_space<vmem>>, vector<32x128xf32>
    %cst_23 = arith.constant dense<0.000000e+00> : vector<16x128xf32>
    %96 = tpu.matmul %94, %95, %cst_23 {dimension_numbers = #tpu.dot_dimension_numbers<[1], [0], [0], [1], [0, 0, 1, 1], [], []>} : vector<16x32xf32>, vector<32x128xf32>, vector<16x128xf32> -> vector<16x128xf32>
    %97 = vector.broadcast %8 : vector<1x128xf32> to vector<16x128xf32>
    %98 = arith.addf %96, %97 : vector<16x128xf32>
    %cst_24 = arith.constant 5.000000e-01 : f32
    %99 = vector.broadcast %cst_24 : f32 to vector<16x128xf32>
    %100 = arith.mulf %99, %98 : vector<16x128xf32>
    %cst_25 = arith.constant 0.707106769 : f32
    %101 = vector.broadcast %cst_25 : f32 to vector<16x128xf32>
    %102 = arith.mulf %98, %101 : vector<16x128xf32>
    %103 = math.absf %102 : vector<16x128xf32>
    %cst_26 = arith.constant 0.327591091 : f32
    %104 = vector.broadcast %cst_26 : f32 to vector<16x128xf32>
    %105 = arith.mulf %104, %103 : vector<16x128xf32>
    %cst_27 = arith.constant 1.000000e+00 : f32
    %106 = vector.broadcast %cst_27 : f32 to vector<16x128xf32>
    %107 = arith.addf %106, %105 : vector<16x128xf32>
    %cst_28 = arith.constant 1.000000e+00 : f32
    %108 = vector.broadcast %cst_28 : f32 to vector<16x128xf32>
    %109 = arith.divf %108, %107 : vector<16x128xf32>
    %cst_29 = arith.constant 1.06140542 : f32
    %110 = vector.broadcast %cst_29 : f32 to vector<16x128xf32>
    %111 = arith.mulf %110, %109 : vector<16x128xf32>
    %cst_30 = arith.constant -1.45315206 : f32
    %112 = vector.broadcast %cst_30 : f32 to vector<16x128xf32>
    %113 = arith.addf %111, %112 : vector<16x128xf32>
    %114 = arith.mulf %113, %109 : vector<16x128xf32>
    %cst_31 = arith.constant 1.42141378 : f32
    %115 = vector.broadcast %cst_31 : f32 to vector<16x128xf32>
    %116 = arith.addf %114, %115 : vector<16x128xf32>
    %117 = arith.mulf %116, %109 : vector<16x128xf32>
    %cst_32 = arith.constant -0.284496725 : f32
    %118 = vector.broadcast %cst_32 : f32 to vector<16x128xf32>
    %119 = arith.addf %117, %118 : vector<16x128xf32>
    %120 = arith.mulf %119, %109 : vector<16x128xf32>
    %cst_33 = arith.constant 0.254829586 : f32
    %121 = vector.broadcast %cst_33 : f32 to vector<16x128xf32>
    %122 = arith.addf %120, %121 : vector<16x128xf32>
    %123 = arith.mulf %122, %109 : vector<16x128xf32>
    %cst_34 = arith.constant 0.000000e+00 : f32
    %124 = vector.broadcast %cst_34 : f32 to vector<16x128xf32>
    %125 = arith.subf %124, %103 : vector<16x128xf32>
    %126 = arith.mulf %125, %103 : vector<16x128xf32>
    %127 = math.exp %126 : vector<16x128xf32>
    %128 = arith.mulf %123, %127 : vector<16x128xf32>
    %cst_35 = arith.constant 1.000000e+00 : f32
    %129 = vector.broadcast %cst_35 : f32 to vector<16x128xf32>
    %130 = arith.subf %129, %128 : vector<16x128xf32>
    %cst_36 = arith.constant 0.000000e+00 : f32
    %131 = vector.broadcast %cst_36 : f32 to vector<16x128xf32>
    %132 = arith.cmpf oge, %102, %131 : vector<16x128xf32>
    %cst_37 = arith.constant 0.000000e+00 : f32
    %133 = vector.broadcast %cst_37 : f32 to vector<16x128xf32>
    %134 = arith.subf %133, %130 : vector<16x128xf32>
    %135 = arith.select %132, %130, %134 : vector<16x128xi1>, vector<16x128xf32>
    %cst_38 = arith.constant 1.000000e+00 : f32
    %136 = vector.broadcast %cst_38 : f32 to vector<16x128xf32>
    %137 = arith.addf %136, %135 : vector<16x128xf32>
    %138 = arith.mulf %100, %137 : vector<16x128xf32>
    %c64 = arith.constant 64 : index
    %c0_39 = arith.constant 0 : index
    %139 = vector.load %arg1[%c64, %c0_39] : memref<360x128xf32, #tpu.memory_space<vmem>>, vector<128x128xf32>
    %cst_40 = arith.constant dense<0.000000e+00> : vector<16x128xf32>
    %140 = tpu.matmul %138, %139, %cst_40 {dimension_numbers = #tpu.dot_dimension_numbers<[1], [0], [0], [1], [0, 0, 1, 1], [], []>} : vector<16x128xf32>, vector<128x128xf32>, vector<16x128xf32> -> vector<16x128xf32>
    %141 = vector.extract_strided_slice %140 {offsets = [0, 0], sizes = [16, 32], strides = [1, 1]} : vector<16x128xf32> to vector<16x32xf32>
    %142 = arith.addf %72, %141 : vector<16x32xf32>
    %143 = vector.broadcast %9 : vector<1x32xf32> to vector<16x32xf32>
    %144 = arith.addf %142, %143 : vector<16x32xf32>
    %c0_41 = arith.constant 0 : index
    %c0_42 = arith.constant 0 : index
    %145 = vector.load %arg2[%c0_41, %c0_42] : memref<16x32xf32, #tpu.memory_space<vmem>>, vector<16x32xf32>
    tpu.vector_store %arg2[%c0_41, %c0_42], %144 {strides = array<i32>} : memref<16x32xf32, #tpu.memory_space<vmem>>, vector<16x32xf32>,
    return
  }
}

</mosaic_0001>

<bundles_post_ra>
// kernel: gpt_block.1
= control target key start
LH: loop header
LB: loop body
LE: loop exit
PB: predicated region body
PF: predicated region fallthrough
CT: control target
= control target key end

     0   :  { %7 = vsyncpa [#allocation3], 0  ;;  %s1447_s0 = inlined_call_operand.hbm [shape: f32[16,32], index: 0, kind: input, shape index: {}]   ;;  %s1448_s1 = inlined_call_operand.hbm [shape: f32[360,128], index: 1, kind: input, shape index: {}]   ;;  %s1449_s2 = inlined_call_operand.hbm [shape: f32[16,32], index: 2, kind: output, shape index: {}]  }
   0x1   :  { %8 = vsyncpa [#allocation6], 0 }
   0x2   :  { %9 = vsyncpa [#allocation4], 0  ;;  %s1267_s9 = smov [#allocation2]  }
   0x3   :  { %s15_s10 = sshll.u32 %s1267_s9, 4  ;;  %s16_s10 = int_to_ptr.vmem [resolvable:$true] %s15_s10 }
   0x4   :  { %s1209_s11 = scalar_lea.vmem %s16_s10, 256  ;;  %p1214_p1 = scmp.lt.s32.totalorder %s16_s10, %s16_s10 }
   0x5   :  { %p1210_p0 = scmp.ne.s32.totalorder %s16_s10, %s1209_s11  ;;  %p1215_p2 = scmp.lt.s32.totalorder %s1209_s11, %s1209_s11 }
   0x7   :  { %p1216_p3 = por %p1215_p2, %p1214_p1 }
   0x9   :  { %p1217_p4 = pnand %p1216_p3, %p1210_p0 }
   0xb   :  { %1220 = shalt.err (!%p1217_p4)
}
   0xc   :  { %s1268_s12 = smov 128   ;;  %s1269_s13 = smov 8  }
   0xd   :  { %21 = dma.hbm_to_vmem [thread:$0]  %s1447_s0, 256, %s16_s10, [#allocation3], %s1268_s12, %s1268_s12, %s1269_s13  }
   0xe   :  { %s1270_s16 = smov [#allocation5]  }
   0xf   :  { %s27_s17 = sshll.u32 %s1270_s16, 4  ;;  %s28_s17 = int_to_ptr.vmem [resolvable:$true] %s27_s17 }
  0x10   :  { %s1229_s18 = scalar_lea.vmem %s28_s17, 5760  ;;  %p1234_p6 = scmp.lt.s32.totalorder %s28_s17, %s28_s17 }
  0x11   :  { %p1230_p5 = scmp.ne.s32.totalorder %s28_s17, %s1229_s18  ;;  %p1235_p7 = scmp.lt.s32.totalorder %s1229_s18, %s1229_s18 }
  0x13   :  { %p1236_p8 = por %p1235_p7, %p1234_p6 }
  0x15   :  { %p1237_p9 = pnand %p1236_p8, %p1230_p5 }
  0x17   :  { %1240 = shalt.err (!%p1237_p9)
}
  0x18   :  { %33 = dma.hbm_to_vmem [thread:$0]  %s1448_s1, 5760, %s28_s17, [#allocation6], %s1268_s12, %s1268_s12, %s1269_s13  }
  0x19   :  { %1261 = dma.done.wait [#allocation3], 256  }
  0x1a   :  { %1262 = vsyncadd [#allocation3], 4294967040 }
  0x1b   :  { %1263 = dma.done.wait [#allocation6], 5760  }
  0x1c   :  { %1264 = vsyncadd [#allocation6], 4294961536  ;;  %vm59_vm0 = vcmask 261120   ;;  %v1301_v0 = vld [vmem:[#allocation2] sm:$0xff]  ;;  %v1303_v1 = vld [vmem:[#allocation2 + $0x8] sm:$0xff]  ;;  %v87_v23 = vlaneseq  ;;  %s1271_s0 = smov 96  }
  0x1d   :  { %v60_v2 = vsel %vm59_vm0, %v1301_v0, 0.0  ;;  %v63_v3 = vsel %vm59_vm0, %v1303_v1, 0.0  ;;  %v102_v14 = vld [vmem:[#allocation5 + $0x18] sm:$0xff]  ;;  %v101_v15 = vld [vmem:[#allocation5 + $0x10] sm:$0xff]  ;;  %v100_v16 = vld [vmem:[#allocation5 + $0x8] sm:$0xff]  ;;  %vm335_vm1 = vcmask 130048  }
  0x1e   :  { %61 = vadd.xlane.f32.xlu0 %v60_v2  ;;  %1046 = vmatprep.subr.mxu0 %v102_v14  ;;  %v99_v17 = vld [vmem:[#allocation5] sm:$0xff]  ;;  %v1313_v25 = vshrl.u32 %v87_v23, 7  ;;  %v1327_v44 = vld [vmem:[#allocation5 + $0xe8] sm:$0xff]  ;;  %v1339_v49 = vld [vmem:[#allocation5 + $0xf0] sm:$0xff]  ;;  %s1272_s1 = smov 64   ;;  %s1273_s21 = smov [#allocation7]  }
  0x1f   :  { %1047 = vmatpush3.msra.mxu0 %v102_v14  ;;  %v1316_v27 = vld [vmem:[#allocation5 + $0xe0] sm:$0xff]  ;;  %v1341_v50 = vld [vmem:[#allocation5 + $0xf8] sm:$0xff]  ;;  %v1351_v54 = vld [vmem:[#allocation5 + $0x108] sm:$0xff]  ;;  %s953_s22 = sshll.u32 %s1273_s21, 4  ;;  %s954_s22 = int_to_ptr.vmem [resolvable:$true] %s953_s22 }
  0x20   :  { %1048 = vmatprep.subr.mxu0 %v101_v15  ;;  %v89_v26 = vsub.s32 0, %v1313_v25  ;;  %v95_v28 = vsub.s32 1, %v1313_v25  ;;  %v105_v39 = vsub.s32 4, %v1313_v25  ;;  %v1348_v53 = vld [vmem:[#allocation5 + $0x100] sm:$0xff]  ;;  %v1358_v57 = vld [vmem:[#allocation5 + $0x110] sm:$0xff]  ;;  %v1361_v58 = vld [vmem:[#allocation5 + $0x118] sm:$0xff]  ;;  %p1246_p11 = scmp.lt.s32.totalorder %s954_s22, %s954_s22 }
  0x21   :  { %1049 = vmatpush3.msra.mxu0 %v101_v15  ;;  %v1368_v61 = vld [vmem:[#allocation5 + $0x120] sm:$0xff]  ;;  %v52_v63 = vld [vmem:[#allocation5 + $0x130] sm:$0xff]  ;;  %s1241_s23 = scalar_lea.vmem %s954_s22, 256 }
  0x22   :  { %64 = vadd.xlane.f32.xlu0 %v63_v3  ;;  %1050 = vmatprep.subr.mxu0 %v100_v16  ;;  %v90_v29 = vrot.slane %v1316_v27, %v89_v26  ;;  %v96_v32 = vrot.slane %v1316_v27, %v95_v28  ;;  %v106_v40 = vrot.slane %v1316_v27, %v105_v39  ;;  %v51_v3 = vld [vmem:[#allocation5 + $0x128] sm:$0xff]  ;;  %v56_v14 = vld [vmem:[#allocation5 + $0x150] sm:$0xff]  ;;  %v57_v26 = vld [vmem:[#allocation5 + $0x158] sm:$0xff]  ;;  %p1242_p10 = scmp.ne.s32.totalorder %s954_s22, %s1241_s23  ;;  %p1247_p12 = scmp.lt.s32.totalorder %s1241_s23, %s1241_s23 }
  0x23   :  { %1051 = vmatpush3.msra.mxu0 %v100_v16 }
  0x24   :  { %1052 = vmatprep.subr.mxu0 %v99_v17  ;;  %p1248_p13 = por %p1247_p12, %p1246_p11 }
  0x25   :  { %1053 = vmatpush3.msra.mxu0 %v99_v17  ;;  %v55_v17 = vld [vmem:[#allocation5 + $0x148] sm:$0xff] }
  0x26   :  { %p1249_p0 = pnand %p1248_p13, %p1242_p10 }
  0xa7   :  { %v62_v4 = vpop.xlane.xlu0 %61 }
  0xa8   :  { %v67_v5 = vmul.f32 0.03125, %v62_v4 }
  0xaa   :  { %v69_v6 = vsub.f32 %v1301_v0, %v67_v5 }
  0xab   :  { %v65_v7 = vpop.xlane.xlu0 %64 }
  0xac   :  { %v68_v8 = vmul.f32 0.03125, %v65_v7  ;;  %v71_v9 = vmul.f32 %v69_v6, %v69_v6 }
  0xae   :  { %v70_v10 = vsub.f32 %v1303_v1, %v68_v8  ;;  %v73_v11 = vsel %vm59_vm0, %v71_v9, 0.0 }
  0xaf   :  { %74 = vadd.xlane.f32.xlu1 %v73_v11 }
  0xb0   :  { %v72_v12 = vmul.f32 %v70_v10, %v70_v10 }
  0xb2   :  { %v76_v13 = vsel %vm59_vm0, %v72_v12, 0.0 }
  0xb3   :  { %77 = vadd.xlane.f32.xlu1 %v76_v13 }
 0x138   :  { %v75_v18 = vpop.xlane.xlu1 %74 }
 0x139   :  { %v79_v19 = vmul.f32 0.03125, %v75_v18 }
 0x13b   :  { %v81_v20 = vadd.f32 1e-05, %v79_v19 }
 0x13c   :  { %v78_v21 = vpop.xlane.xlu1 %77 }
 0x13d   :  { %1153 = vrsqrt.f32 %v81_v20  ;;  %v80_v22 = vmul.f32 0.03125, %v78_v21 }
 0x13f   :  { %v82_v24 = vadd.f32 1e-05, %v80_v22  ;;  %v58_v22 = vld [vmem:[#allocation5 + $0x160] sm:$0xff] }
 0x141   :  { %1155 = vrsqrt.f32 %v82_v24 }
 0x14a   :  { %v1154_v30 = vpop.eup %1153 }
 0x14b   :  { %v85_v31 = vmul.f32 %v1154_v30, %v69_v6  ;;  %v54_v6 = vld [vmem:[#allocation5 + $0x140] sm:$0xff] }
 0x14d   :  { %v91_v33 = vmul.f32 %v90_v29, %v85_v31 }
 0x14e   :  { %v1156_v34 = vpop.eup %1155 }
 0x14f   :  { %v86_v35 = vmul.f32 %v1156_v34, %v70_v10  ;;  %v97_v36 = vadd.f32 %v96_v32, %v91_v33  ;;  %v53_v10 = vld [vmem:[#allocation5 + $0x138] sm:$0xff] }
 0x151   :  { %v92_v37 = vmul.f32 %v90_v29, %v86_v35  ;;  %1054 = vmatprep.mubr.msk.f32.mxu0 %vm59_vm0, %v97_v36 }
 0x153   :  { %v98_v38 = vadd.f32 %v96_v32, %v92_v37 }
 0x155   :  { %1055 = vmatmul.mubr.msk.f32.vlgmr.msra.gmra.mxu0 %vm59_vm0, %v98_v38 }
 0x215   :  { %v1056_v41 = vpop.f32.mrf.mxu0 }
 0x216   :  { %v1325_v42 = vadd.f32 %v1056_v41, %v106_v40 }
 0x217   :  { %v179_v43 = vpop.f32.mrf.mxu0 }
 0x218   :  { %v1329_v45 = vadd.f32 %v179_v43, %v106_v40  ;;  %200 = vrot.lane.b32.xlu0 %v1325_v42, %s1271_s0  ;;  %v189_v51 = vmul.f32 %v1325_v42, %v1339_v49  ;;  %v191_v55 = vmul.f32 %v1325_v42, %v1348_v53  ;;  %v193_v59 = vmul.f32 %v1325_v42, %v1358_v57 }
 0x219   :  { %v195_v62 = vmul.f32 %v1325_v42, %v1368_v61 }
 0x21a   :  { %198 = vrot.lane.b32.xlu1 %v1329_v45, %s1271_s0  ;;  %v188_v46 = vmul.f32 %v1329_v45, %v1327_v44  ;;  %v190_v52 = vmul.f32 %v1329_v45, %v1341_v50  ;;  %v192_v56 = vmul.f32 %v1329_v45, %v1351_v54  ;;  %v194_v60 = vmul.f32 %v1329_v45, %v1361_v58 }
 0x21c   :  { %1061 = vmatprep.mubr.msk.f32.mxu1 %vm59_vm0, %v188_v46 }
 0x28a   :  { %v201_v47 = vpop.permute.xlu0 %200 }
 0x28b   :  { %1057 = vmatprep.subr.msk.mxu1 %vm59_vm0, %v201_v47 }
 0x28c   :  { %1058 = vmatpush3.xpose.msk.msra.mxu1 %vm59_vm0, %v201_v47  ;;  %v199_v48 = vpop.permute.xlu1 %198 }
 0x28d   :  { %1059 = vmatprep.subr.msk.mxu1 %vm59_vm0, %v199_v48 }
 0x290   :  { %1060 = vmatpush3.xpose.msk.msra.mxu1 %vm59_vm0, %v199_v48 }
 0x293   :  { %1062 = vmatmul.mubr.msk.f32.vlgmr.msra.gmra.mxu1 %vm59_vm0, %v189_v51 }
 0x294   :  { %1064 = vmatprep.mubr.msk.f32.mxu1 %vm59_vm0, %v190_v52 }
 0x297   :  { %1065 = vmatmul.mubr.msk.f32.gmra.mxu1 %vm59_vm0, %v191_v55 }
 0x298   :  { %1067 = vmatprep.mubr.msk.f32.mxu1 %vm59_vm0, %v192_v56 }
 0x29b   :  { %1068 = vmatmul.mubr.msk.f32.gmra.mxu1 %vm59_vm0, %v193_v59 }
 0x29c   :  { %1070 = vmatprep.mubr.msk.f32.mxu1 %vm59_vm0, %v194_v60 }
 0x29f   :  { %1071 = vmatmul.mubr.msk.f32.gmra.mxu1 %vm59_vm0, %v195_v62 }
 0x353   :  { %v1063_v2 = vpop.f32.mrf.mxu1 }
 0x354   :  { %v302_v4 = vadd.f32 %v1063_v2, %v52_v63 }
 0x355   :  { %v296_v5 = vpop.f32.mrf.mxu1 }
 0x356   :  { %v297_v7 = vadd.f32 %v296_v5, %v51_v3  ;;  %v339_v8 = vsel %vm335_vm1, %v302_v4, -inf }
 0x357   :  { %340 = vmax.xlane.f32.xlu0 %v339_v8  ;;  %v1066_v9 = vpop.f32.mrf.mxu1 }
 0x358   :  { %v312_v11 = vadd.f32 %v1066_v9, %v54_v6  ;;  %v336_v12 = vsel %vm335_vm1, %v297_v7, -inf }
 0x359   :  { %v306_v13 = vpop.f32.mrf.mxu1  ;;  %337 = vmax.xlane.f32.xlu1 %v336_v12 }
 0x35a   :  { %v307_v15 = vadd.f32 %v306_v13, %v53_v10  ;;  %v345_v20 = vsel %vm335_vm1, %v312_v11, -inf }
 0x35b   :  { %v1069_v16 = vpop.f32.mrf.mxu1 }
 0x35c   :  { %v322_v18 = vadd.f32 %v1069_v16, %v56_v14  ;;  %v342_v19 = vsel %vm335_vm1, %v307_v15, -inf }
 0x35d   :  { %v316_v21 = vpop.f32.mrf.mxu1  ;;  %343 = vmax.xlane.f32.xlu0 %v342_v19  ;;  %346 = vmax.xlane.f32.xlu1 %v345_v20 }
 0x35e   :  { %v317_v23 = vadd.f32 %v316_v21, %v55_v17  ;;  %v351_v30 = vsel %vm335_vm1, %v322_v18, -inf }
 0x35f   :  { %v1072_v24 = vpop.f32.mrf.mxu1 }
 0x360   :  { %v332_v28 = vadd.f32 %v1072_v24, %v58_v22  ;;  %v348_v29 = vsel %vm335_vm1, %v317_v23, -inf }
 0x361   :  { %v326_v31 = vpop.f32.mrf.mxu1  ;;  %349 = vmax.xlane.f32.xlu0 %v348_v29  ;;  %352 = vmax.xlane.f32.xlu1 %v351_v30 }
 0x362   :  { %v327_v32 = vadd.f32 %v326_v31, %v57_v26  ;;  %v357_v34 = vsel %vm335_vm1, %v332_v28, -inf }
 0x364   :  { %v354_v33 = vsel %vm335_vm1, %v327_v32, -inf }
 0x365   :  { %355 = vmax.xlane.f32.xlu0 %v354_v33  ;;  %358 = vmax.xlane.f32.xlu1 %v357_v34 }
 0x3e0   :  { %v341_v35 = vpop.xlane.xlu0 %340 }
 0x3e1   :  { %v361_v36 = vsub.f32 %v302_v4, %v341_v35 }
 0x3e2   :  { %v338_v37 = vpop.xlane.xlu1 %337 }
 0x3e3   :  { %v370_v38 = vmul.f32 1.442695, %v361_v36  ;;  %v360_v39 = vsub.f32 %v297_v7, %v338_v37 }
 0x3e5   :  { %1157 = vpow2.f32 %v370_v38  ;;  %v368_v40 = vmul.f32 1.442695, %v360_v39 }
 0x3e6   :  { %v344_v41 = vpop.xlane.xlu0 %343  ;;  %v347_v43 = vpop.xlane.xlu1 %346 }
 0x3e7   :  { %1159 = vpow2.f32 %v368_v40  ;;  %v362_v46 = vsub.f32 %v307_v15, %v344_v41  ;;  %v363_v47 = vsub.f32 %v312_v11, %v347_v43 }
 0x3e9   :  { %v372_v48 = vmul.f32 1.442695, %v362_v46  ;;  %v374_v51 = vmul.f32 1.442695, %v363_v47 }
 0x3ea   :  { %v350_v52 = vpop.xlane.xlu0 %349  ;;  %v353_v55 = vpop.xlane.xlu1 %352 }
 0x3eb   :  { %1161 = vpow2.f32 %v372_v48  ;;  %v364_v56 = vsub.f32 %v317_v23, %v350_v52  ;;  %v365_v59 = vsub.f32 %v322_v18, %v353_v55 }
 0x3ec   :  { %1163 = vpow2.f32 %v374_v51 }
 0x3ed   :  { %v376_v60 = vmul.f32 1.442695, %v364_v56  ;;  %v378_v62 = vmul.f32 1.442695, %v365_v59  ;;  %v576_v56 = vld [vmem:[#allocation5 + $0xd8] sm:$0xff]  ;;  %v575_v59 = vld [vmem:[#allocation5 + $0xd0] sm:$0xff] }
 0x3ee   :  { %v356_v63 = vpop.xlane.xlu0 %355  ;;  %v359_v2 = vpop.xlane.xlu1 %358 }
 0x3ef   :  { %1165 = vpow2.f32 %v376_v60  ;;  %v366_v3 = vsub.f32 %v327_v32, %v356_v63  ;;  %v367_v4 = vsub.f32 %v332_v28, %v359_v2  ;;  %v574_v60 = vld [vmem:[#allocation5 + $0xc8] sm:$0xff] }
 0x3f0   :  { %1167 = vpow2.f32 %v378_v62  ;;  %v573_v62 = vld [vmem:[#allocation5 + $0xc0] sm:$0xff] }
 0x3f1   :  { %v380_v5 = vmul.f32 1.442695, %v366_v3  ;;  %v382_v6 = vmul.f32 1.442695, %v367_v4 }
 0x3f2   :  { %v1158_v7 = vpop.eup %1157 }
 0x3f3   :  { %1169 = vpow2.f32 %v380_v5  ;;  %v387_v8 = vsel %vm335_vm1, %v1158_v7, 0.0 }
 0x3f4   :  { %v1160_v9 = vpop.eup %1159  ;;  %1171 = vpow2.f32 %v382_v6  ;;  %388 = vadd.xlane.f32.xlu1 %v387_v8 }
 0x3f5   :  { %v384_v10 = vsel %vm335_vm1, %v1160_v9, 0.0 }
 0x3f6   :  { %385 = vadd.xlane.f32.xlu0 %v384_v10 }
 0x3f8   :  { %v1162_v11 = vpop.eup %1161 }
 0x3f9   :  { %v1164_v12 = vpop.eup %1163  ;;  %v390_v13 = vsel %vm335_vm1, %v1162_v11, 0.0 }
 0x3fa   :  { %391 = vadd.xlane.f32.xlu0 %v390_v13  ;;  %v393_v14 = vsel %vm335_vm1, %v1164_v12, 0.0 }
 0x3fb   :  { %394 = vadd.xlane.f32.xlu1 %v393_v14 }
 0x3fc   :  { %v1166_v15 = vpop.eup %1165 }
 0x3fd   :  { %v1168_v16 = vpop.eup %1167  ;;  %v396_v17 = vsel %vm335_vm1, %v1166_v15, 0.0 }
 0x3fe   :  { %397 = vadd.xlane.f32.xlu0 %v396_v17  ;;  %v399_v18 = vsel %vm335_vm1, %v1168_v16, 0.0 }
 0x3ff   :  { %400 = vadd.xlane.f32.xlu1 %v399_v18 }
 0x400   :  { %v1170_v19 = vpop.eup %1169 }
 0x401   :  { %v1172_v20 = vpop.eup %1171  ;;  %v402_v21 = vsel %vm335_vm1, %v1170_v19, 0.0 }
 0x402   :  { %403 = vadd.xlane.f32.xlu0 %v402_v21  ;;  %v405_v22 = vsel %vm335_vm1, %v1172_v20, 0.0 }
 0x403   :  { %406 = vadd.xlane.f32.xlu1 %v405_v22 }
 0x414   :  { %424 = vrot.lane.b32.xlu1 %v1329_v45, %s1272_s1 }
 0x418   :  { %426 = vrot.lane.b32.xlu0 %v1325_v42, %s1272_s1 }
 0x47d   :  { %v389_v23 = vpop.xlane.xlu1 %388 }
 0x47f   :  { %v386_v24 = vpop.xlane.xlu0 %385 }
 0x480   :  { %1173 = vrcp.f32 %v386_v24 }
 0x481   :  { %1175 = vrcp.f32 %v389_v23 }
 0x483   :  { %v392_v26 = vpop.xlane.xlu0 %391 }
 0x484   :  { %1177 = vrcp.f32 %v392_v26  ;;  %v395_v28 = vpop.xlane.xlu1 %394 }
 0x485   :  { %1179 = vrcp.f32 %v395_v28 }
 0x487   :  { %v398_v29 = vpop.xlane.xlu0 %397 }
 0x488   :  { %1181 = vrcp.f32 %v398_v29  ;;  %v401_v30 = vpop.xlane.xlu1 %400 }
 0x489   :  { %1183 = vrcp.f32 %v401_v30 }
 0x48b   :  { %v404_v31 = vpop.xlane.xlu0 %403 }
 0x48c   :  { %1185 = vrcp.f32 %v404_v31  ;;  %v407_v32 = vpop.xlane.xlu1 %406 }
 0x48d   :  { %v1174_v33 = vpop.eup %1173  ;;  %1187 = vrcp.f32 %v407_v32 }
 0x48e   :  { %v416_v45 = vmul.f32 %v1174_v33, %v1160_v9  ;;  %v1176_v34 = vpop.eup %1175 }
 0x48f   :  { %v427_v42 = vpop.permute.xlu0 %426  ;;  %v417_v37 = vmul.f32 %v1176_v34, %v1158_v7  ;;  %v707_v34 = vld [vmem:[#allocation5 + $0x38] sm:$0xff] }
 0x490   :  { %1073 = vmatprep.subr.mxu0 %v427_v42  ;;  %1077 = vmatprep.mubr.msk.f32.mxu0 %vm335_vm1, %v416_v45  ;;  %v425_v36 = vpop.permute.xlu1 %424 }
 0x491   :  { %v1178_v35 = vpop.eup %1177  ;;  %1074 = vmatpush3.msra.mxu0 %v427_v42  ;;  %v706_v42 = vld [vmem:[#allocation5 + $0x30] sm:$0xff] }
 0x492   :  { %1075 = vmatprep.subr.mxu0 %v425_v36  ;;  %v418_v38 = vmul.f32 %v1178_v35, %v1162_v11  ;;  %v1180_v39 = vpop.eup %1179  ;;  %v705_v35 = vld [vmem:[#allocation5 + $0x28] sm:$0xff] }
 0x493   :  { %1076 = vmatpush3.msra.mxu0 %v425_v36  ;;  %v419_v41 = vmul.f32 %v1180_v39, %v1164_v12  ;;  %v704_v36 = vld [vmem:[#allocation5 + $0x20] sm:$0xff] }
 0x494   :  { %1078 = vmatmul.mubr.msk.f32.vlgmr.msra.gmra.mxu0 %vm335_vm1, %v417_v37  ;;  %1089 = vmatprep.subr.mxu0 %v576_v56 }
 0x495   :  { %v1182_v40 = vpop.eup %1181  ;;  %1080 = vmatprep.mubr.msk.f32.mxu0 %vm335_vm1, %v418_v38  ;;  %1090 = vmatpush3.msra.mxu0 %v576_v56 }
 0x496   :  { %v420_v43 = vmul.f32 %v1182_v40, %v1166_v15  ;;  %v1184_v46 = vpop.eup %1183  ;;  %1091 = vmatprep.subr.mxu0 %v575_v59 }
 0x497   :  { %v421_v48 = vmul.f32 %v1184_v46, %v1168_v16  ;;  %1092 = vmatpush3.msra.mxu0 %v575_v59  ;;  %v694_v46 = vsub.s32 2, %v1313_v25 }
 0x498   :  { %1081 = vmatmul.mubr.msk.f32.gmra.mxu0 %vm335_vm1, %v419_v41  ;;  %1093 = vmatprep.subr.mxu0 %v574_v60 }
 0x499   :  { %v1186_v47 = vpop.eup %1185  ;;  %1083 = vmatprep.mubr.msk.f32.mxu0 %vm335_vm1, %v420_v43  ;;  %1094 = vmatpush3.msra.mxu0 %v574_v60 }
 0x49a   :  { %v422_v51 = vmul.f32 %v1186_v47, %v1170_v19  ;;  %v1188_v52 = vpop.eup %1187  ;;  %1095 = vmatprep.subr.mxu0 %v573_v62 }
 0x49b   :  { %v423_v55 = vmul.f32 %v1188_v52, %v1172_v20  ;;  %1096 = vmatpush3.msra.mxu0 %v573_v62 }
 0x49c   :  { %1084 = vmatmul.mubr.msk.f32.gmra.mxu0 %vm335_vm1, %v421_v48  ;;  %1100 = vmatprep.subr.mxu0 %v707_v34  ;;  %v695_v48 = vrot.slane %v1316_v27, %v694_v46 }
 0x49d   :  { %1086 = vmatprep.mubr.msk.f32.mxu0 %vm335_vm1, %v422_v51  ;;  %v700_v51 = vsub.s32 3, %v1313_v25 }
 0x49f   :  { %v701_v60 = vrot.slane %v1316_v27, %v700_v51 }
 0x4a0   :  { %1087 = vmatmul.mubr.msk.f32.gmra.mxu0 %vm335_vm1, %v423_v55 }
 0x554   :  { %v1079_v63 = vpop.f32.mrf.mxu0 }
 0x555   :  { %v560_v11 = vmul.f32 %v1079_v63, %v1339_v49 }
 0x556   :  { %v520_v2 = vpop.f32.mrf.mxu0 }
 0x557   :  { %v559_v9 = vmul.f32 %v520_v2, %v1327_v44  ;;  %v660_v44 = vsub.s32 5, %v1313_v25 }
 0x558   :  { %v1082_v3 = vpop.f32.mrf.mxu0 }
 0x559   :  { %v562_v7 = vmul.f32 %v1082_v3, %v1348_v53  ;;  %v661_v49 = vrot.slane %v1316_v27, %v660_v44  ;;  %v862_v3 = vld [vmem:[#allocation5 + $0xb8] sm:$0xff] }
 0x55a   :  { %v530_v4 = vpop.f32.mrf.mxu0  ;;  %1111 = vmatprep.subr.mxu1 %v862_v3 }
 0x55b   :  { %v561_v6 = vmul.f32 %v530_v4, %v1341_v50  ;;  %v568_v15 = vadd.f32 %v562_v7, %v560_v11  ;;  %1112 = vmatpush3.msra.mxu1 %v862_v3  ;;  %v861_v4 = vld [vmem:[#allocation5 + $0xb0] sm:$0xff]  ;;  %v858_v7 = vld [vmem:[#allocation5 + $0x98] sm:$0xff] }
 0x55c   :  { %v1085_v5 = vpop.f32.mrf.mxu0  ;;  %1113 = vmatprep.subr.mxu1 %v861_v4  ;;  %v854_v11 = vld [vmem:[#allocation5 + $0x78] sm:$0xff] }
 0x55d   :  { %v564_v12 = vmul.f32 %v1085_v5, %v1358_v57  ;;  %v567_v14 = vadd.f32 %v561_v6, %v559_v9  ;;  %1114 = vmatpush3.msra.mxu1 %v861_v4  ;;  %v860_v5 = vld [vmem:[#allocation5 + $0xa8] sm:$0xff]  ;;  %v859_v6 = vld [vmem:[#allocation5 + $0xa0] sm:$0xff] }
 0x55e   :  { %v540_v8 = vpop.f32.mrf.mxu0  ;;  %1115 = vmatprep.subr.mxu1 %v860_v5  ;;  %v856_v9 = vld [vmem:[#allocation5 + $0x88] sm:$0xff] }
 0x55f   :  { %v563_v10 = vmul.f32 %v540_v8, %v1351_v54  ;;  %v570_v19 = vadd.f32 %v568_v15, %v564_v12  ;;  %1116 = vmatpush3.msra.mxu1 %v860_v5  ;;  %v857_v8 = vld [vmem:[#allocation5 + $0x90] sm:$0xff]  ;;  %v850_v15 = vld [vmem:[#allocation5 + $0x58] sm:$0xff] }
 0x560   :  { %v1088_v13 = vpop.f32.mrf.mxu0  ;;  %1117 = vmatprep.subr.mxu1 %v859_v6  ;;  %v853_v12 = vld [vmem:[#allocation5 + $0x70] sm:$0xff] }
 0x561   :  { %v566_v16 = vmul.f32 %v1088_v13, %v1368_v61  ;;  %v569_v18 = vadd.f32 %v567_v14, %v563_v10  ;;  %1118 = vmatpush3.msra.mxu1 %v859_v6  ;;  %v855_v10 = vld [vmem:[#allocation5 + $0x80] sm:$0xff]  ;;  %v852_v13 = vld [vmem:[#allocation5 + $0x68] sm:$0xff] }
 0x562   :  { %v550_v17 = vpop.f32.mrf.mxu0  ;;  %1119 = vmatprep.subr.mxu1 %v858_v7  ;;  %v851_v14 = vld [vmem:[#allocation5 + $0x60] sm:$0xff] }
 0x563   :  { %v565_v50 = vmul.f32 %v550_v17, %v1361_v58  ;;  %v572_v20 = vadd.f32 %v570_v19, %v566_v16  ;;  %1120 = vmatpush3.msra.mxu1 %v858_v7  ;;  %v849_v16 = vld [vmem:[#allocation5 + $0x50] sm:$0xff]  ;;  %v848_v17 = vld [vmem:[#allocation5 + $0x48] sm:$0xff] }
 0x564   :  { %1121 = vmatprep.subr.mxu1 %v857_v8 }
 0x565   :  { %v571_v53 = vadd.f32 %v569_v18, %v565_v50  ;;  %1122 = vmatpush3.msra.mxu1 %v857_v8  ;;  %v847_v18 = vld [vmem:[#allocation5 + $0x40] sm:$0xff]  ;;  %v710_v50 = vsub.s32 6, %v1313_v25 }
 0x566   :  { %1123 = vmatprep.subr.mxu1 %v856_v9 }
 0x567   :  { %1097 = vmatprep.mubr.msk.f32.mxu0 %vm59_vm0, %v571_v53  ;;  %1124 = vmatpush3.msra.mxu1 %v856_v9  ;;  %v711_v19 = vrot.slane %v1316_v27, %v710_v50 }
 0x568   :  { %1098 = vmatmul.mubr.msk.f32.vlgmr.msra.gmra.mxu0 %vm59_vm0, %v572_v20  ;;  %1125 = vmatprep.subr.mxu1 %v855_v10 }
 0x569   :  { %1101 = vmatpush3.msra.mxu0 %v707_v34  ;;  %1126 = vmatpush3.msra.mxu1 %v855_v10 }
 0x56a   :  { %1102 = vmatprep.subr.mxu0 %v706_v42  ;;  %1127 = vmatprep.subr.mxu1 %v854_v11 }
 0x56b   :  { %1103 = vmatpush3.msra.mxu0 %v706_v42  ;;  %1128 = vmatpush3.msra.mxu1 %v854_v11 }
 0x56c   :  { %1104 = vmatprep.subr.mxu0 %v705_v35  ;;  %1129 = vmatprep.subr.mxu1 %v853_v12 }
 0x56d   :  { %1105 = vmatpush3.msra.mxu0 %v705_v35  ;;  %1130 = vmatpush3.msra.mxu1 %v853_v12 }
 0x56e   :  { %1106 = vmatprep.subr.mxu0 %v704_v36  ;;  %1131 = vmatprep.subr.mxu1 %v852_v13 }
 0x56f   :  { %1107 = vmatpush3.msra.mxu0 %v704_v36  ;;  %1132 = vmatpush3.msra.mxu1 %v852_v13 }
 0x570   :  { %1133 = vmatprep.subr.mxu1 %v851_v14 }
 0x571   :  { %1134 = vmatpush3.msra.mxu1 %v851_v14 }
 0x572   :  { %1135 = vmatprep.subr.mxu1 %v850_v15 }
 0x573   :  { %1136 = vmatpush3.msra.mxu1 %v850_v15  ;;  %v942_v15 = vsub.s32 7, %v1313_v25 }
 0x574   :  { %1137 = vmatprep.subr.mxu1 %v849_v16 }
 0x575   :  { %1138 = vmatpush3.msra.mxu1 %v849_v16  ;;  %v943_v16 = vrot.slane %v1316_v27, %v942_v15 }
 0x576   :  { %1139 = vmatprep.subr.mxu1 %v848_v17 }
 0x577   :  { %1140 = vmatpush3.msra.mxu1 %v848_v17 }
 0x578   :  { %1141 = vmatprep.subr.mxu1 %v847_v18 }
 0x579   :  { %1142 = vmatpush3.msra.mxu1 %v847_v18 }
 0x628   :  { %v1099_v54 = vpop.f32.mrf.mxu0 }
 0x629   :  { %v663_v57 = vadd.f32 %v1099_v54, %v661_v49 }
 0x62a   :  { %v649_v21 = vpop.f32.mrf.mxu0 }
 0x62b   :  { %v1414_v61 = vadd.f32 %v663_v57, %v1303_v1  ;;  %v662_v22 = vadd.f32 %v661_v49, %v649_v21 }
 0x62d   :  { %v1417_v58 = vadd.f32 %v662_v22, %v1301_v0  ;;  %v669_v23 = vsel %vm59_vm0, %v1414_v61, 0.0 }
 0x62e   :  { %670 = vadd.xlane.f32.xlu0 %v669_v23 }
 0x62f   :  { %v666_v24 = vsel %vm59_vm0, %v1417_v58, 0.0 }
 0x630   :  { %667 = vadd.xlane.f32.xlu1 %v666_v24 }
 0x6b7   :  { %v671_v26 = vpop.xlane.xlu0 %670 }
 0x6b8   :  { %v673_v28 = vmul.f32 0.03125, %v671_v26 }
 0x6b9   :  { %v668_v29 = vpop.xlane.xlu1 %667 }
 0x6ba   :  { %v675_v30 = vsub.f32 %v1414_v61, %v673_v28  ;;  %v672_v31 = vmul.f32 0.03125, %v668_v29 }
 0x6bc   :  { %v674_v1 = vsub.f32 %v1417_v58, %v672_v31  ;;  %v677_v32 = vmul.f32 %v675_v30, %v675_v30 }
 0x6be   :  { %v681_v0 = vsel %vm59_vm0, %v677_v32, 0.0  ;;  %v676_v33 = vmul.f32 %v674_v1, %v674_v1 }
 0x6bf   :  { %682 = vadd.xlane.f32.xlu1 %v681_v0 }
 0x6c0   :  { %v678_v45 = vsel %vm59_vm0, %v676_v33, 0.0 }
 0x6c1   :  { %679 = vadd.xlane.f32.xlu0 %v678_v45 }
 0x748   :  { %v683_v37 = vpop.xlane.xlu1 %682 }
 0x749   :  { %v685_v38 = vmul.f32 0.03125, %v683_v37 }
 0x74a   :  { %v680_v39 = vpop.xlane.xlu0 %679 }
 0x74b   :  { %v687_v40 = vadd.f32 1e-05, %v685_v38  ;;  %v684_v41 = vmul.f32 0.03125, %v680_v39 }
 0x74d   :  { %1189 = vrsqrt.f32 %v687_v40  ;;  %v686_v43 = vadd.f32 1e-05, %v684_v41 }
 0x74f   :  { %1191 = vrsqrt.f32 %v686_v43 }
 0x75a   :  { %v1190_v47 = vpop.eup %1189 }
 0x75b   :  { %v691_v52 = vmul.f32 %v1190_v47, %v675_v30 }
 0x75c   :  { %v1192_v55 = vpop.eup %1191 }
 0x75d   :  { %v690_v56 = vmul.f32 %v1192_v55, %v674_v1  ;;  %v697_v59 = vmul.f32 %v695_v48, %v691_v52 }
 0x75f   :  { %v696_v62 = vmul.f32 %v695_v48, %v690_v56  ;;  %v703_v2 = vadd.f32 %v701_v60, %v697_v59 }
 0x761   :  { %v702_v63 = vadd.f32 %v701_v60, %v696_v62 }
 0x763   :  { %1108 = vmatprep.mubr.msk.f32.mxu0 %vm59_vm0, %v702_v63 }
 0x764   :  { %1109 = vmatmul.mubr.msk.f32.vlgmr.msra.gmra.mxu0 %vm59_vm0, %v703_v2 }
 0x824   :  { %v1110_v53 = vpop.f32.mrf.mxu0 }
 0x825   :  { %v790_v20 = vadd.f32 %v1110_v53, %v711_v19 }
 0x826   :  { %v784_v44 = vpop.f32.mrf.mxu0 }
 0x827   :  { %v796_v49 = vmul.f32 0.70710677, %v790_v20  ;;  %v785_v54 = vadd.f32 %v784_v44, %v711_v19  ;;  %v794_v12 = vmul.f32 0.5, %v790_v20 }
 0x829   :  { %v798_v57 = vand.u32 2147483647, %v796_v49  ;;  %v795_v21 = vmul.f32 0.70710677, %v785_v54  ;;  %vm838_vm2 = vcmp.ge.f32.partialorder %v796_v49, 0.0  ;;  %v793_v10 = vmul.f32 0.5, %v785_v54 }
 0x82b   :  { %v800_v22 = vmul.f32 0.3275911, %v798_v57  ;;  %v797_v23 = vand.u32 2147483647, %v795_v21  ;;  %v826_v29 = vsub.f32 0.0, %v798_v57  ;;  %vm837_vm3 = vcmp.ge.f32.partialorder %v795_v21, 0.0 }
 0x82d   :  { %v802_v24 = vadd.f32 1.0, %v800_v22  ;;  %v799_v26 = vmul.f32 0.3275911, %v797_v23  ;;  %v825_v30 = vsub.f32 0.0, %v797_v23  ;;  %v828_v31 = vmul.f32 %v826_v29, %v798_v57 }
 0x82f   :  { %1193 = vrcp.f32 %v802_v24  ;;  %v801_v28 = vadd.f32 1.0, %v799_v26  ;;  %v827_v32 = vmul.f32 %v825_v30, %v797_v23  ;;  %v831_v33 = vmul.f32 1.442695, %v828_v31 }
 0x831   :  { %1195 = vrcp.f32 %v801_v28  ;;  %v829_v42 = vmul.f32 1.442695, %v827_v32 }
 0x832   :  { %1197 = vpow2.f32 %v831_v33 }
 0x833   :  { %1199 = vpow2.f32 %v829_v42 }
 0x83c   :  { %v1194_v1 = vpop.eup %1193 }
 0x83d   :  { %v808_v0 = vmul.f32 1.0614054, %v1194_v1 }
 0x83e   :  { %v1196_v45 = vpop.eup %1195 }
 0x83f   :  { %v810_v34 = vadd.f32 -1.4531521, %v808_v0  ;;  %v807_v35 = vmul.f32 1.0614054, %v1196_v45  ;;  %v1198_v56 = vpop.eup %1197 }
 0x840   :  { %v1200_v63 = vpop.eup %1199 }
 0x841   :  { %v812_v36 = vmul.f32 %v1194_v1, %v810_v34  ;;  %v809_v37 = vadd.f32 -1.4531521, %v807_v35 }
 0x843   :  { %v814_v38 = vadd.f32 1.4214138, %v812_v36  ;;  %v811_v39 = vmul.f32 %v1196_v45, %v809_v37 }
 0x845   :  { %v816_v40 = vmul.f32 %v1194_v1, %v814_v38  ;;  %v813_v41 = vadd.f32 1.4214138, %v811_v39 }
 0x847   :  { %v818_v43 = vadd.f32 -0.28449672, %v816_v40  ;;  %v815_v46 = vmul.f32 %v1196_v45, %v813_v41 }
 0x849   :  { %v820_v47 = vmul.f32 %v1194_v1, %v818_v43  ;;  %v817_v48 = vadd.f32 -0.28449672, %v815_v46 }
 0x84b   :  { %v822_v51 = vadd.f32 0.2548296, %v820_v47  ;;  %v819_v52 = vmul.f32 %v1196_v45, %v817_v48 }
 0x84d   :  { %v824_v55 = vmul.f32 %v1194_v1, %v822_v51  ;;  %v821_v59 = vadd.f32 0.2548296, %v819_v52 }
 0x84f   :  { %v834_v60 = vmul.f32 %v1198_v56, %v824_v55  ;;  %v823_v62 = vmul.f32 %v1196_v45, %v821_v59 }
 0x851   :  { %v836_v2 = vsub.f32 1.0, %v834_v60  ;;  %v833_v3 = vmul.f32 %v1200_v63, %v823_v62 }
 0x853   :  { %v840_v4 = vsub.f32 0.0, %v836_v2  ;;  %v835_v5 = vsub.f32 1.0, %v833_v3 }
 0x855   :  { %v842_v6 = vsel %vm838_vm2, %v836_v2, %v840_v4  ;;  %v839_v7 = vsub.f32 0.0, %v835_v5 }
 0x856   :  { %v844_v8 = vadd.f32 1.0, %v842_v6 }
 0x857   :  { %v841_v9 = vsel %vm837_vm3, %v835_v5, %v839_v7 }
 0x858   :  { %v843_v11 = vadd.f32 1.0, %v841_v9  ;;  %v846_v14 = vmul.f32 %v844_v8, %v794_v12 }
 0x85a   :  { %v845_v13 = vmul.f32 %v843_v11, %v793_v10 }
 0x85c   :  { %1143 = vmatprep.mubr.f32.mxu1 %v845_v13 }
 0x85d   :  { %1144 = vmatmul.mubr.f32.vlgmr.msra.gmra.mxu1 %v846_v14 }
 0x91d   :  { %v1145_v17 = vpop.f32.mrf.mxu1 }
 0x91e   :  { %v939_v18 = vadd.f32 %v1145_v17, %v1414_v61 }
 0x91f   :  { %v929_v50 = vpop.f32.mrf.mxu1 }
 0x920   :  { %v945_v19 = vadd.f32 %v943_v16, %v939_v18  ;;  %v938_v53 = vadd.f32 %v929_v50, %v1417_v58 }
 0x922   :  { %947 = vst.msk [vmem:[#allocation7 + $0x8] sm:$0xff] %vm59_vm0, %v945_v19  ;;  %v944_v20 = vadd.f32 %v943_v16, %v938_v53 }
 0x924   :  { %946 = vst.msk [vmem:[#allocation7] sm:$0xff] %vm59_vm0, %v944_v20 }
 0x925   :  { %1252 = shalt.err (!%p1249_p0)
}
 0x926   :  { %959 = dma.vmem_to_hbm [thread:$0]  %s954_s22, 256, %s1449_s2, [#allocation4], %s1268_s12, %s1268_s12, %s1269_s13  }
 0x927   :  { %1265 = dma.done.wait [#allocation4], 256  }
 0x928   :  { %1266 = vsyncadd [#allocation4], 4294967040 }
 0x929   :  { %963 = vsyncpa [#allocation3], 1 }
 0x92a   :  { %964 = vsyncpa [#allocation6], 1 }
 0x92b   :  { %965 = vsyncpa [#allocation4], 1 }

</bundles_post_ra>
